<compile_context>
chip_gen: v7x
topology: tpu7x:2x2x1
jax: 0.10.0
libtpu: 0.0.40
codegen_flags: <defaults>
</compile_context>

<pallas_src>
import functools

import numpy as np

import jax
import jax.numpy as jnp
from jax.experimental import pallas as pl
from jax.experimental.pallas import tpu as pltpu

# ----------------------------------------------------------------------------
# Swin-B configuration (torchvision.models.swin_b)
# ----------------------------------------------------------------------------
PATCH_SIZE = 4
EMBED_DIM = 128
DEPTHS = (2, 2, 18, 2)
NUM_HEADS = (4, 8, 16, 32)
WINDOW_SIZE = 7
MLP_RATIO = 4.0
NUM_CLASSES = 10
LN_EPS = 1e-5


# ----------------------------------------------------------------------------
# Generation-aware VMEM budgets
# ----------------------------------------------------------------------------
def _detect_vmem_capacity():
    try:
        info = pltpu.get_tpu_info()
        cap = int(getattr(info, "vmem_capacity_bytes", 0))
        if cap > 0:
            return cap
    except Exception:
        pass
    # Conservative fallback (v7x-sized VMEM) so we never over-request.
    return 64 * 1024 * 1024


_VMEM_CAP = _detect_vmem_capacity()
_BIG_VMEM = _VMEM_CAP >= 100 * 1024 * 1024          # v5e / v6e: 128 MiB physical
_VMEM_LIMIT = 96 * 1024 * 1024 if _BIG_VMEM else 44 * 1024 * 1024
_W_BUDGET = 8 * 1024 * 1024 if _BIG_VMEM else 4 * 1024 * 1024   # per weight block


# ----------------------------------------------------------------------------
# In-kernel helpers
# ----------------------------------------------------------------------------
def _erf(x):
    # Abramowitz & Stegun 7.1.26, |err| <= 1.5e-7 (Mosaic-safe primitives only).
    ax = jnp.abs(x)
    t = 1.0 / (1.0 + 0.3275911 * ax)
    poly = t * (0.254829592 + t * (-0.284496736 + t * (1.421413741
                + t * (-1.453152027 + t * 1.061405429))))
    y = 1.0 - poly * jnp.exp(-ax * ax)
    return jnp.where(x >= 0.0, y, -y)


def _gelu_exact(x):
    return 0.5 * x * (1.0 + _erf(x * 0.7071067811865476))


def _layernorm_val(x, g, b):
    mean = jnp.mean(x, axis=-1, keepdims=True)
    var = jnp.mean((x - mean) * (x - mean), axis=-1, keepdims=True)
    return (x - mean) * jax.lax.rsqrt(var + LN_EPS) * g + b


# ----------------------------------------------------------------------------
# Pallas kernels
# ----------------------------------------------------------------------------
def _linear_kernel(x_ref, w_ref, b_ref, o_ref):
    # y = x @ w + b   x:(TM,K) f32, w:(K,TN) bf16, b:(1,TN) f32 -> o:(TM,TN)
    o_ref[...] = (
        jnp.dot(x_ref[...].astype(jnp.bfloat16), w_ref[...],
                preferred_element_type=jnp.float32)
        + b_ref[...]
    ).astype(o_ref.dtype)


def _layernorm_kernel(x_ref, g_ref, b_ref, o_ref):
    o_ref[...] = _layernorm_val(x_ref[...], g_ref[...], b_ref[...])


def _linear_ln_kernel(x_ref, w_ref, b_ref, g_ref, bt_ref, o_ref):
    # y = LayerNorm(x @ w + b)  (patch embedding: conv-as-matmul + norm)
    y = (jnp.dot(x_ref[...].astype(jnp.bfloat16), w_ref[...],
                 preferred_element_type=jnp.float32) + b_ref[...])
    o_ref[...] = _layernorm_val(y, g_ref[...], bt_ref[...])


def _ln_linear_kernel(x_ref, g_ref, bt_ref, w_ref, b_ref, o_ref, xn_ref):
    # y = LayerNorm(x) @ w + b, LN (f32) computed once per row tile at j == 0
    # and cached in a bf16 VMEM scratch.
    @pl.when(pl.program_id(1) == 0)
    def _():
        xn_ref[...] = _layernorm_val(x_ref[...], g_ref[...], bt_ref[...]).astype(
            jnp.bfloat16)

    o_ref[...] = (
        jnp.dot(xn_ref[...], w_ref[...], preferred_element_type=jnp.float32)
        + b_ref[...]
    ).astype(o_ref.dtype)


def _ln_mlp_kernel(x_ref, g_ref, bt_ref, w1_ref, b1_ref, w2_ref, b2_ref,
                   o_ref, xn_ref):
    # out = x + GELU(LayerNorm(x) @ W1 + b1) @ W2 + b2, tiled over the hidden dim
    # (grid axis 1). The output block index is constant over j, so o_ref stays
    # VMEM-resident and doubles as the f32 accumulator; the residual add is fused
    # by seeding o_ref with x + b2 at j == 0.
    j = pl.program_id(1)

    @pl.when(j == 0)
    def _():
        xn_ref[...] = _layernorm_val(x_ref[...], g_ref[...], bt_ref[...]).astype(
            jnp.bfloat16)
        o_ref[...] = x_ref[...] + b2_ref[...]

    h = (jnp.dot(xn_ref[...], w1_ref[...], preferred_element_type=jnp.float32)
         + b1_ref[...])
    h = _gelu_exact(h)
    o_ref[...] += jnp.dot(h.astype(jnp.bfloat16), w2_ref[...],
                          preferred_element_type=jnp.float32)


def _window_attn_kernel(*refs, num_heads, head_dim, scale, group, masked):
    # One group of `group` (window, image) rows per grid step, output projection
    # fused. qkv:(G,N,3C) bf16, rel_bias:(heads,N,N) f32 (VMEM resident),
    # mask:(G,N,N) f32 (shifted blocks only), proj_w:(C,C) bf16 (VMEM resident),
    # proj_b:(1,C) f32, out:(G,N,C) f32, ctx scratch:(G,N,C) bf16.
    if masked:
        qkv_ref, rb_ref, mask_ref, pw_ref, pb_ref, o_ref, ctx_ref = refs
    else:
        qkv_ref, rb_ref, pw_ref, pb_ref, o_ref, ctx_ref = refs

    C = num_heads * head_dim
    if masked:
        mask = mask_ref[...]

    for h in range(num_heads):
        lo = h * head_dim
        q = qkv_ref[:, :, lo:lo + head_dim]
        k = qkv_ref[:, :, C + lo:C + lo + head_dim]
        v = qkv_ref[:, :, 2 * C + lo:2 * C + lo + head_dim]
        attn = jax.lax.dot_general(
            q, k, (((2,), (2,)), ((0,), (0,))),
            preferred_element_type=jnp.float32)
        attn = attn * scale + rb_ref[h]
        if masked:
            attn = attn + mask
        attn = attn - jnp.max(attn, axis=-1, keepdims=True)
        p = jnp.exp(attn)
        p = p * pl.reciprocal(jnp.sum(p, axis=-1, keepdims=True), approx=True)
        ctx = jax.lax.dot_general(
            p.astype(jnp.bfloat16), v, (((2,), (1,)), ((0,), (0,))),
            preferred_element_type=jnp.float32)
        ctx_ref[:, :, lo:lo + head_dim] = ctx.astype(jnp.bfloat16)

    # Fused output projection: one lane-dense (N, C) x (C, C) matmul per row.
    for g in range(group):
        o_ref[g] = (jnp.dot(ctx_ref[g], pw_ref[...],
                            preferred_element_type=jnp.float32) + pb_ref[...])


# ----------------------------------------------------------------------------
# Tile selection
# ----------------------------------------------------------------------------
def _pick_tm(M, cap=512):
    return M if M <= cap else cap  # cap is a multiple of 8; ragged edge is masked


def _pick_tn(K, N, budget):
    # Column tile for a bf16 (K, tn) weight block; never drop below 256 lanes.
    if K * N * 2 <= budget:
        return N
    for tn in (4096, 2048, 1024, 512, 256):
        if N % tn == 0 and K * tn * 2 <= budget:
            return tn
    return 256 if N % 256 == 0 else N


def _pick_group(R, N, C):
    # Rows (window, image) processed per attention grid step.
    row_bytes = N * (12 * C + 8 * N)
    cap = max(1, min(16, (6 * 1024 * 1024) // max(row_bytes, 1)))
    g = 1
    for d in range(1, min(R, cap) + 1):
        if R % d == 0:
            g = d
    return g


# ----------------------------------------------------------------------------
# Pallas wrappers
# ----------------------------------------------------------------------------
@jax.jit
def linear(x, w, b):
    """x:(M,K) f32, w:(K,N) bf16, b:(N,) f32 -> (M,N) f32."""
    M, K = x.shape
    N = w.shape[1]
    tm = _pick_tm(M)
    tn = _pick_tn(K, N, _W_BUDGET)
    return pl.pallas_call(
        _linear_kernel,
        grid=(pl.cdiv(M, tm), N // tn),
        out_shape=jax.ShapeDtypeStruct((M, N), jnp.float32),
        in_specs=[
            pl.BlockSpec((tm, K), lambda i, j: (i, 0)),
            pl.BlockSpec((K, tn), lambda i, j: (0, j)),
            pl.BlockSpec((1, tn), lambda i, j: (0, j)),
        ],
        out_specs=pl.BlockSpec((tm, tn), lambda i, j: (i, j)),
        compiler_params=pltpu.CompilerParams(
            dimension_semantics=("parallel", "parallel"),
            vmem_limit_bytes=_VMEM_LIMIT),
    )(x, w, b.reshape(1, N))


@jax.jit
def layernorm(x, gamma, beta):
    """x:(M,C) f32 -> (M,C) f32, row-tiled."""
    M, C = x.shape
    tm = _pick_tm(M, cap=1024)
    return pl.pallas_call(
        _layernorm_kernel,
        grid=(pl.cdiv(M, tm),),
        out_shape=jax.ShapeDtypeStruct((M, C), jnp.float32),
        in_specs=[
            pl.BlockSpec((tm, C), lambda i: (i, 0)),
            pl.BlockSpec((1, C), lambda i: (0, 0)),
            pl.BlockSpec((1, C), lambda i: (0, 0)),
        ],
        out_specs=pl.BlockSpec((tm, C), lambda i: (i, 0)),
        compiler_params=pltpu.CompilerParams(
            dimension_semantics=("parallel",)),
    )(x, gamma.reshape(1, C), beta.reshape(1, C))


@jax.jit
def linear_ln(x, w, b, gamma, beta):
    """LayerNorm(x @ w + b) fused (patch embedding).  x:(M,K) f32, w:(K,N) bf16."""
    M, K = x.shape
    N = w.shape[1]
    tm = _pick_tm(M, cap=1024)
    return pl.pallas_call(
        _linear_ln_kernel,
        grid=(pl.cdiv(M, tm),),
        out_shape=jax.ShapeDtypeStruct((M, N), jnp.float32),
        in_specs=[
            pl.BlockSpec((tm, K), lambda i: (i, 0)),
            pl.BlockSpec((K, N), lambda i: (0, 0)),
            pl.BlockSpec((1, N), lambda i: (0, 0)),
            pl.BlockSpec((1, N), lambda i: (0, 0)),
            pl.BlockSpec((1, N), lambda i: (0, 0)),
        ],
        out_specs=pl.BlockSpec((tm, N), lambda i: (i, 0)),
        compiler_params=pltpu.CompilerParams(
            dimension_semantics=("parallel",),
            vmem_limit_bytes=_VMEM_LIMIT),
    )(x, w, b.reshape(1, N), gamma.reshape(1, N), beta.reshape(1, N))


@functools.partial(jax.jit, static_argnames=("out_dtype",))
def ln_linear(x, gamma, beta, w, b, out_dtype=jnp.float32):
    """LayerNorm(x) @ w + b fused.  x:(M,K) f32, w:(K,N) bf16, b:(N,) f32."""
    M, K = x.shape
    N = w.shape[1]
    tm = _pick_tm(M)
    tn = _pick_tn(K, N, _W_BUDGET)
    return pl.pallas_call(
        _ln_linear_kernel,
        grid=(pl.cdiv(M, tm), N // tn),
        out_shape=jax.ShapeDtypeStruct((M, N), out_dtype),
        in_specs=[
            pl.BlockSpec((tm, K), lambda i, j: (i, 0)),
            pl.BlockSpec((1, K), lambda i, j: (0, 0)),
            pl.BlockSpec((1, K), lambda i, j: (0, 0)),
            pl.BlockSpec((K, tn), lambda i, j: (0, j)),
            pl.BlockSpec((1, tn), lambda i, j: (0, j)),
        ],
        out_specs=pl.BlockSpec((tm, tn), lambda i, j: (i, j)),
        scratch_shapes=[pltpu.VMEM((tm, K), jnp.bfloat16)],
        compiler_params=pltpu.CompilerParams(
            dimension_semantics=("parallel", "arbitrary"),
            vmem_limit_bytes=_VMEM_LIMIT),
    )(x, gamma.reshape(1, K), beta.reshape(1, K), w, b.reshape(1, N))


@jax.jit
def ln_mlp(x, gamma, beta, w1, b1, w2, b2):
    """Fused residual MLP: x + (GELU(LayerNorm(x) @ W1 + b1) @ W2 + b2)."""
    M, K = x.shape
    Nh = w1.shape[1]
    tm = _pick_tm(M)
    tnh = _pick_tn(K, Nh, _W_BUDGET)
    return pl.pallas_call(
        _ln_mlp_kernel,
        grid=(pl.cdiv(M, tm), Nh // tnh),
        out_shape=jax.ShapeDtypeStruct((M, K), jnp.float32),
        in_specs=[
            pl.BlockSpec((tm, K), lambda i, j: (i, 0)),
            pl.BlockSpec((1, K), lambda i, j: (0, 0)),
            pl.BlockSpec((1, K), lambda i, j: (0, 0)),
            pl.BlockSpec((K, tnh), lambda i, j: (0, j)),
            pl.BlockSpec((1, tnh), lambda i, j: (0, j)),
            pl.BlockSpec((tnh, K), lambda i, j: (j, 0)),
            pl.BlockSpec((1, K), lambda i, j: (0, 0)),
        ],
        out_specs=pl.BlockSpec((tm, K), lambda i, j: (i, 0)),
        scratch_shapes=[pltpu.VMEM((tm, K), jnp.bfloat16)],
        compiler_params=pltpu.CompilerParams(
            dimension_semantics=("parallel", "arbitrary"),
            vmem_limit_bytes=_VMEM_LIMIT),
    )(x, gamma.reshape(1, K), beta.reshape(1, K), w1, b1.reshape(1, Nh),
      w2, b2.reshape(1, K))


def window_attention(qkv, rel_bias, mask, proj_w, proj_b, *, num_heads, scale,
                     group):
    """qkv:(R,N,3C) bf16, rel_bias:(heads,N,N) f32, mask:(R,N,N) f32 or None,
    proj_w:(C,C) bf16, proj_b:(C,) f32 -> (R,N,C) f32 (post output-projection)."""
    R, N, threeC = qkv.shape
    C = threeC // 3
    hd = C // num_heads
    masked = mask is not None
    kernel = functools.partial(_window_attn_kernel, num_heads=num_heads,
                               head_dim=hd, scale=scale, group=group,
                               masked=masked)
    in_specs = [
        pl.BlockSpec((group, N, threeC), lambda g: (g, 0, 0)),
        pl.BlockSpec((num_heads, N, N), lambda g: (0, 0, 0)),
    ]
    inputs = [qkv, rel_bias]
    if masked:
        in_specs.append(pl.BlockSpec((group, N, N), lambda g: (g, 0, 0)))
        inputs.append(mask)
    in_specs += [
        pl.BlockSpec((C, C), lambda g: (0, 0)),
        pl.BlockSpec((1, C), lambda g: (0, 0)),
    ]
    inputs += [proj_w, proj_b.reshape(1, C)]
    return pl.pallas_call(
        kernel,
        grid=(R // group,),
        out_shape=jax.ShapeDtypeStruct((R, N, C), jnp.float32),
        in_specs=in_specs,
        out_specs=pl.BlockSpec((group, N, C), lambda g: (g, 0, 0)),
        scratch_shapes=[pltpu.VMEM((group, N, C), jnp.bfloat16)],
        compiler_params=pltpu.CompilerParams(
            dimension_semantics=("parallel",),
            vmem_limit_bytes=_VMEM_LIMIT),
    )(*inputs)


# ----------------------------------------------------------------------------
# Swin building blocks (glue in plain JAX, compute in the kernels above)
# ----------------------------------------------------------------------------
def _compute_attn_mask(pH, pW, ws, sh, sw):
    # Mirrors torchvision's shifted_window_attention mask construction.
    img = np.zeros((pH, pW), dtype=np.float32)
    h_slices = (slice(0, -ws), slice(-ws, -sh), slice(-sh, None))
    w_slices = (slice(0, -ws), slice(-ws, -sw), slice(-sw, None))
    cnt = 0
    for hs in h_slices:
        for wsl in w_slices:
            img[hs, wsl] = cnt
            cnt += 1
    nwh, nww = pH // ws, pW // ws
    m = img.reshape(nwh, ws, nww, ws).transpose(0, 2, 1, 3).reshape(nwh * nww, ws * ws)
    diff = m[:, None, :] - m[:, :, None]
    mask = np.where(diff != 0, -100.0, 0.0).astype(np.float32)
    return jnp.asarray(mask)  # (num_windows, N, N)


def shifted_window_attention(x, blk, num_heads, ws, shift):
    """x is the *pre-norm* residual input (B,H,W,C); norm1 is fused into qkv and
    the output projection is fused into the attention kernel."""
    B, H, W, C = x.shape

    # Fused LayerNorm(norm1) + qkv projection, bf16 output (consumers cast anyway).
    qkv = ln_linear(x.reshape(-1, C), blk["norm1_g"], blk["norm1_b"],
                    blk["qkv_w"], blk["qkv_b"], out_dtype=jnp.bfloat16)
    qkv = qkv.reshape(B, H, W, 3 * C)

    # Pad to window multiples.  torchvision pads the normalized map with zeros
    # *before* qkv, so pad tokens carry qkv == qkv_bias; reproduce that exactly
    # with the (qkv - b) pad + b trick.
    pad_r = (ws - W % ws) % ws
    pad_b = (ws - H % ws) % ws
    if pad_r or pad_b:
        qb = blk["qkv_b"].astype(jnp.bfloat16).reshape(1, 1, 1, 3 * C)
        qkv = jnp.pad(qkv - qb, ((0, 0), (0, pad_b), (0, pad_r), (0, 0))) + qb
    pH, pW = H + pad_b, W + pad_r

    sh = 0 if ws >= pH else shift
    sw = 0 if ws >= pW else shift
    if sh + sw > 0:
        qkv = jnp.roll(qkv, shift=(-sh, -sw), axis=(1, 2))

    nwh, nww = pH // ws, pW // ws
    nw = nwh * nww
    N = ws * ws
    # Window-major fold: rows ordered (window, image) so a block of `group`
    # consecutive rows shares rel_bias/proj_w and has a per-row mask.
    qkv = (qkv.reshape(B, nwh, ws, nww, ws, 3 * C)
              .transpose(1, 3, 0, 2, 4, 5)
              .reshape(nw * B, N, 3 * C))

    if sh + sw > 0:
        mask = _compute_attn_mask(pH, pW, ws, sh, sw)  # (nw, N, N)
        mask = jnp.broadcast_to(mask[:, None], (nw, B, N, N)).reshape(nw * B, N, N)
    else:
        mask = None  # no mask allocation / DMA for the non-shifted half of blocks

    group = _pick_group(nw * B, N, C)
    scale = float((C // num_heads) ** -0.5)
    o = window_attention(qkv, blk["rel_bias"], mask, blk["proj_w"], blk["proj_b"],
                         num_heads=num_heads, scale=scale, group=group)

    o = (o.reshape(nwh, nww, B, ws, ws, C)
          .transpose(2, 0, 3, 1, 4, 5)
          .reshape(B, pH, pW, C))
    if sh + sw > 0:
        o = jnp.roll(o, shift=(sh, sw), axis=(1, 2))
    return o[:, :H, :W, :]


def swin_block(x, blk, num_heads, ws, shift):
    B, H, W, C = x.shape
    x = x + shifted_window_attention(x, blk, num_heads, ws, shift)
    # Residual add is fused inside ln_mlp: out = x + MLP(LN(x)).
    y = ln_mlp(x.reshape(-1, C), blk["norm2_g"], blk["norm2_b"],
               blk["mlp1_w"], blk["mlp1_b"], blk["mlp2_w"], blk["mlp2_b"])
    return y.reshape(B, H, W, C)


def patch_merging(x, mp):
    B, H, W, C = x.shape
    x = jnp.pad(x, ((0, 0), (0, H % 2), (0, W % 2), (0, 0)))
    x0 = x[:, 0::2, 0::2, :]
    x1 = x[:, 1::2, 0::2, :]
    x2 = x[:, 0::2, 1::2, :]
    x3 = x[:, 1::2, 1::2, :]
    x = jnp.concatenate([x0, x1, x2, x3], axis=-1)
    B2, H2, W2, C4 = x.shape
    x = ln_linear(x.reshape(-1, C4), mp["norm_g"], mp["norm_b"],
                  mp["red_w"], mp["red_b"])  # reduction bias is zeros (bias=False)
    return x.reshape(B2, H2, W2, 2 * C)


def patch_embed(x, pe):
    # Conv2d(3, 128, k=4, s=4) expressed as patch-flatten + fused matmul+LN kernel.
    B, Cin, H, W = x.shape
    P = PATCH_SIZE
    Ho, Wo = H // P, W // P
    x = (x.reshape(B, Cin, Ho, P, Wo, P)
          .transpose(0, 2, 4, 1, 3, 5)           # (B, Ho, Wo, Cin, P, P)
          .reshape(B * Ho * Wo, Cin * P * P))
    x = linear_ln(x, pe["proj_w"], pe["proj_b"], pe["norm_g"], pe["norm_b"])
    return x.reshape(B, Ho, Wo, EMBED_DIM)


def swin_b_forward(x, params):
    x = patch_embed(x, params["patch_embed"])
    for s in range(4):
        heads = NUM_HEADS[s]
        for b in range(DEPTHS[s]):
            shift = 0 if b % 2 == 0 else WINDOW_SIZE // 2
            x = swin_block(x, params["stages"][s]["blocks"][b], heads,
                           WINDOW_SIZE, shift)
        if s < 3:
            x = patch_merging(x, params["stages"][s]["merge"])
    B, H, W, C = x.shape
    x = layernorm(x.reshape(-1, C), params["norm_g"], params["norm_b"])
    x = jnp.mean(x.reshape(B, H * W, C), axis=1)  # permute + AdaptiveAvgPool2d(1)
    logits = linear(x, params["head_w"], params["head_b"])  # lane-padded head
    return logits[:, :NUM_CLASSES]


swin_b_forward_jit = jax.jit(swin_b_forward)


# ----------------------------------------------------------------------------
# Deterministic parameter construction (synthetic weights, correct shapes)
# ----------------------------------------------------------------------------
def _rel_position_bias(rng, ws, heads):
    coords = np.stack(np.meshgrid(np.arange(ws), np.arange(ws), indexing="ij"))
    flat = coords.reshape(2, -1)
    rel = (flat[:, :, None] - flat[:, None, :]).transpose(1, 2, 0).astype(np.int64)
    rel[..., 0] += ws - 1
    rel[..., 1] += ws - 1
    rel[..., 0] *= 2 * ws - 1
    idx = rel.sum(-1).reshape(-1)
    table = rng.normal(0.0, 0.02, ((2 * ws - 1) ** 2, heads)).astype(np.float32)
    N = ws * ws
    return jnp.asarray(table[idx].reshape(N, N, heads).transpose(2, 0, 1))


def build_params(num_classes, seed=0):
    rng = np.random.default_rng(seed)

    def w(shape, std=0.02):
        # Matmul weights are stored in bf16 (MXU-native).
        return jnp.asarray(rng.normal(0.0, std, shape).astype(np.float32)).astype(
            jnp.bfloat16)

    def zeros(n):
        return jnp.zeros((n,), jnp.float32)

    def ones(n):
        return jnp.ones((n,), jnp.float32)

    params = {
        "patch_embed": dict(
            proj_w=w((3 * PATCH_SIZE * PATCH_SIZE, EMBED_DIM)),
            proj_b=zeros(EMBED_DIM),
            norm_g=ones(EMBED_DIM),
            norm_b=zeros(EMBED_DIM),
        )
    }
    stages = []
    dim = EMBED_DIM
    for s in range(4):
        heads = NUM_HEADS[s]
        hidden = int(dim * MLP_RATIO)
        blocks = []
        for _ in range(DEPTHS[s]):
            blocks.append(
                dict(
                    norm1_g=ones(dim), norm1_b=zeros(dim),
                    qkv_w=w((dim, 3 * dim)), qkv_b=zeros(3 * dim),
                    proj_w=w((dim, dim)), proj_b=zeros(dim),
                    rel_bias=_rel_position_bias(rng, WINDOW_SIZE, heads),
                    norm2_g=ones(dim), norm2_b=zeros(dim),
                    mlp1_w=w((dim, hidden)), mlp1_b=zeros(hidden),
                    mlp2_w=w((hidden, dim)), mlp2_b=zeros(dim),
                )
            )
        stage = {"blocks": blocks}
        if s < 3:
            stage["merge"] = dict(
                norm_g=ones(4 * dim),
                norm_b=zeros(4 * dim),
                red_w=w((4 * dim, 2 * dim)),
                red_b=zeros(2 * dim),  # Linear(bias=False)
            )
            dim *= 2
        stages.append(stage)
    params["stages"] = stages
    params["norm_g"] = ones(dim)      # dim == 1024
    params["norm_b"] = zeros(dim)

    # Classifier head padded to a 128-lane multiple (lane-dense stores); the extra
    # columns are zero and sliced off in the forward pass.
    n_pad = ((num_classes + 127) // 128) * 128
    head_w = np.zeros((dim, n_pad), np.float32)
    head_w[:, :num_classes] = rng.normal(0.0, 0.02, (dim, num_classes)).astype(
        np.float32)
    params["head_w"] = jnp.asarray(head_w).astype(jnp.bfloat16)
    params["head_b"] = jnp.zeros((n_pad,), jnp.float32)
    return params


# ----------------------------------------------------------------------------
# Main
# ----------------------------------------------------------------------------
if __name__ == "__main__":
    key = jax.random.PRNGKey(0)
    # Small NCHW input (must be divisible by patch size 4): (B=2, C=3, 32, 32)
    x = jax.random.normal(key, (2, 3, 32, 32), dtype=jnp.float32)

    params = build_params(NUM_CLASSES, seed=0)

    logits = swin_b_forward_jit(x, params)
    logits = jax.block_until_ready(logits)

    assert logits.shape == (2, NUM_CLASSES), logits.shape
    assert bool(jnp.all(jnp.isfinite(logits)))
    print("KERNEL_OK")
</pallas_src>

<mosaic_0001>
module attributes {stable_mosaic.version = 11 : i64} {
  func.func @_linear_ln_kernel(%arg0: i32, %arg1: memref<128x48xf32, #tpu.memory_space<vmem>>, %arg2: memref<48x128xbf16, #tpu.memory_space<vmem>>, %arg3: memref<1x128xf32, #tpu.memory_space<vmem>>, %arg4: memref<1x128xf32, #tpu.memory_space<vmem>>, %arg5: memref<1x128xf32, #tpu.memory_space<vmem>>, %arg6: memref<128x128xf32, #tpu.memory_space<vmem>>) attributes {dimension_semantics = [#tpu.dimension_semantics<parallel>], iteration_bounds = array<i64: 1>, scalar_prefetch = 0 : i64, scratch_operands = 0 : i64, tpu.core_type = #tpu.core_type<tc>, window_params = [{transform_indices = @transform_0, window_bounds = array<i64: 128, 48>}, {pipeline_mode = #tpu.pipeline_mode<synchronous>, transform_indices = @transform_1, window_bounds = array<i64: 48, 128>}, {pipeline_mode = #tpu.pipeline_mode<synchronous>, transform_indices = @transform_2, window_bounds = array<i64: 1, 128>}, {pipeline_mode = #tpu.pipeline_mode<synchronous>, transform_indices = @transform_3, window_bounds = array<i64: 1, 128>}, {pipeline_mode = #tpu.pipeline_mode<synchronous>, transform_indices = @transform_4, window_bounds = array<i64: 1, 128>}, {transform_indices = @transform_5, window_bounds = array<i64: 128, 128>}]} {
    %c0 = arith.constant 0 : index
    %c0_0 = arith.constant 0 : index
    %0 = vector.load %arg1[%c0, %c0_0] : memref<128x48xf32, #tpu.memory_space<vmem>>, vector<128x48xf32>
    %1 = arith.truncf %0 : vector<128x48xf32> to vector<128x48xbf16>
    %c0_1 = arith.constant 0 : index
    %c0_2 = arith.constant 0 : index
    %2 = vector.load %arg2[%c0_1, %c0_2] : memref<48x128xbf16, #tpu.memory_space<vmem>>, vector<48x128xbf16>
    %cst = arith.constant dense<0.000000e+00> : vector<128x128xf32>
    %3 = tpu.matmul %1, %2, %cst {dimension_numbers = #tpu.dot_dimension_numbers<[1], [0], [0], [1], [0, 0, 1, 1], [], []>} : vector<128x48xbf16>, vector<48x128xbf16>, vector<128x128xf32> -> vector<128x128xf32>
    %c0_3 = arith.constant 0 : index
    %c0_4 = arith.constant 0 : index
    %4 = vector.load %arg3[%c0_3, %c0_4] : memref<1x128xf32, #tpu.memory_space<vmem>>, vector<1x128xf32>
    %5 = vector.broadcast %4 : vector<1x128xf32> to vector<128x128xf32>
    %6 = arith.addf %3, %5 : vector<128x128xf32>
    %c0_5 = arith.constant 0 : index
    %c0_6 = arith.constant 0 : index
    %7 = vector.load %arg4[%c0_5, %c0_6] : memref<1x128xf32, #tpu.memory_space<vmem>>, vector<1x128xf32>
    %c0_7 = arith.constant 0 : index
    %c0_8 = arith.constant 0 : index
    %8 = vector.load %arg5[%c0_7, %c0_8] : memref<1x128xf32, #tpu.memory_space<vmem>>, vector<1x128xf32>
    %cst_9 = arith.constant dense<0.000000e+00> : vector<128xf32>
    %9 = vector.multi_reduction <add>, %6, %cst_9 [1] : vector<128x128xf32> to vector<128xf32>
    %10 = vector.shape_cast %9 : vector<128xf32> to vector<128x1xf32>
    %cst_10 = arith.constant 1.280000e+02 : f32
    %11 = vector.broadcast %cst_10 : f32 to vector<128x1xf32>
    %12 = arith.divf %10, %11 : vector<128x1xf32>
    %13 = vector.broadcast %12 : vector<128x1xf32> to vector<128x128xf32>
    %14 = arith.subf %6, %13 : vector<128x128xf32>
    %15 = vector.broadcast %12 : vector<128x1xf32> to vector<128x128xf32>
    %16 = arith.subf %6, %15 : vector<128x128xf32>
    %17 = arith.mulf %14, %16 : vector<128x128xf32>
    %cst_11 = arith.constant dense<0.000000e+00> : vector<128xf32>
    %18 = vector.multi_reduction <add>, %17, %cst_11 [1] : vector<128x128xf32> to vector<128xf32>
    %19 = vector.shape_cast %18 : vector<128xf32> to vector<128x1xf32>
    %cst_12 = arith.constant 1.280000e+02 : f32
    %20 = vector.broadcast %cst_12 : f32 to vector<128x1xf32>
    %21 = arith.divf %19, %20 : vector<128x1xf32>
    %22 = vector.broadcast %12 : vector<128x1xf32> to vector<128x128xf32>
    %23 = arith.subf %6, %22 : vector<128x128xf32>
    %cst_13 = arith.constant 9.99999974E-6 : f32
    %24 = vector.broadcast %cst_13 : f32 to vector<128x1xf32>
    %25 = arith.addf %21, %24 : vector<128x1xf32>
    %26 = math.rsqrt %25 : vector<128x1xf32>
    %27 = vector.broadcast %26 : vector<128x1xf32> to vector<128x128xf32>
    %28 = arith.mulf %23, %27 : vector<128x128xf32>
    %29 = vector.broadcast %7 : vector<1x128xf32> to vector<128x128xf32>
    %30 = arith.mulf %28, %29 : vector<128x128xf32>
    %31 = vector.broadcast %8 : vector<1x128xf32> to vector<128x128xf32>
    %32 = arith.addf %30, %31 : vector<128x128xf32>
    %c0_14 = arith.constant 0 : index
    %c0_15 = arith.constant 0 : index
    %33 = vector.load %arg6[%c0_14, %c0_15] : memref<128x128xf32, #tpu.memory_space<vmem>>, vector<128x128xf32>
    tpu.vector_store %arg6[%c0_14, %c0_15], %32 {strides = array<i32>} : memref<128x128xf32, #tpu.memory_space<vmem>>, vector<128x128xf32>,
    return
  }
  func.func @transform_0(%arg0: i32) -> (i32, i32) {
    %c0_i32 = arith.constant 0 : i32
    %c0_i32_0 = arith.constant 0 : i32
    return %arg0, %c0_i32 : i32, i32
  }
  func.func @transform_1(%arg0: i32) -> (i32, i32) {
    %c0_i32 = arith.constant 0 : i32
    %c0_i32_0 = arith.constant 0 : i32
    %c0_i32_1 = arith.constant 0 : i32
    return %c0_i32, %c0_i32_0 : i32, i32
  }
  func.func @transform_2(%arg0: i32) -> (i32, i32) {
    %c0_i32 = arith.constant 0 : i32
    %c0_i32_0 = arith.constant 0 : i32
    %c0_i32_1 = arith.constant 0 : i32
    return %c0_i32, %c0_i32_0 : i32, i32
  }
  func.func @transform_3(%arg0: i32) -> (i32, i32) {
    %c0_i32 = arith.constant 0 : i32
    %c0_i32_0 = arith.constant 0 : i32
    %c0_i32_1 = arith.constant 0 : i32
    return %c0_i32, %c0_i32_0 : i32, i32
  }
  func.func @transform_4(%arg0: i32) -> (i32, i32) {
    %c0_i32 = arith.constant 0 : i32
    %c0_i32_0 = arith.constant 0 : i32
    %c0_i32_1 = arith.constant 0 : i32
    return %c0_i32, %c0_i32_0 : i32, i32
  }
  func.func @transform_5(%arg0: i32) -> (i32, i32) {
    %c0_i32 = arith.constant 0 : i32
    %c0_i32_0 = arith.constant 0 : i32
    return %arg0, %c0_i32 : i32, i32
  }
}

</mosaic_0001>

<bundles_post_ra>
// kernel: linear_ln.1
= control target key start
LH: loop header
LB: loop body
LE: loop exit
PB: predicated region body
PF: predicated region fallthrough
CT: control target
= control target key end

     0   :  { %vm77_vm0 = vcmask 392192   ;;  %s824_s0 = inlined_call_operand.vmem [shape: f32[128,48], index: 0, kind: input, shape index: {}]   ;;  %s825_s1 = inlined_call_operand.vmem [shape: bf16[48,128], index: 1, kind: input, shape index: {}]   ;;  %s826_s2 = inlined_call_operand.vmem [shape: f32[1,128], index: 2, kind: input, shape index: {}]   ;;  %s827_s3 = inlined_call_operand.vmem [shape: f32[1,128], index: 3, kind: input, shape index: {}]   ;;  %s828_s4 = inlined_call_operand.vmem [shape: f32[1,128], index: 4, kind: input, shape index: {}]   ;;  %s829_s5 = inlined_call_operand.hbm [shape: f32[128,128], index: 5, kind: output, shape index: {}]  }
   0x1   :  { %v510_v0 = vld [vmem:[%s825_s1] sm:$0xff]   ;;  %v511_v1 = vld [vmem:[%s825_s1 + $0x8] sm:$0xff]   ;;  %v512_v5 = vld [vmem:[%s825_s1 + $0x10] sm:$0xff]  }
   0x2   :  { %479 = vmatprep.subr.bf16.mxu0 %v510_v0  ;;  %501 = vmatprep.subr.bf16.mxu1 %v510_v0  ;;  %v22_v2 = vld [vmem:[%s824_s0] sm:$0xff]  ;;  %v23_v3 = vld [vmem:[%s824_s0 + $0x8] sm:$0xff]  ;;  %v24_v9 = vld [vmem:[%s824_s0 + $0x10] sm:$0xff] }
   0x3   :  { %480 = vmatpush3.bf16.msra.mxu0 %v510_v0  ;;  %504 = vmatpush3.bf16.msra.mxu1 %v510_v0  ;;  %v30_v4 = vld [vmem:[%s824_s0 + $0x40] sm:$0xff]  ;;  %v38_v6 = vpack.c.bf16 %v23_v3, %v22_v2  ;;  %v31_v7 = vld [vmem:[%s824_s0 + $0x48] sm:$0xff]  ;;  %v25_v10 = vld [vmem:[%s824_s0 + $0x18] sm:$0xff] }
   0x4   :  { %481 = vmatprep.subr.bf16.mxu0 %v511_v1  ;;  %502 = vmatprep.subr.bf16.mxu1 %v511_v1  ;;  %v42_v8 = vpack.c.bf16 %v31_v7, %v30_v4  ;;  %v32_v11 = vld [vmem:[%s824_s0 + $0x50] sm:$0xff]  ;;  %v33_v12 = vld [vmem:[%s824_s0 + $0x58] sm:$0xff]  ;;  %v26_v13 = vld [vmem:[%s824_s0 + $0x20] sm:$0xff] }
   0x5   :  { %485 = vmatprep.mubr.msk.bf16.mxu0 %vm77_vm0, %v38_v6  ;;  %v27_v14 = vld [vmem:[%s824_s0 + $0x28] sm:$0xff]  ;;  %v34_v15 = vld [vmem:[%s824_s0 + $0x60] sm:$0xff] }
   0x6   :  { %v35_v16 = vld [vmem:[%s824_s0 + $0x68] sm:$0xff] }
   0x7   :  { %482 = vmatpush3.bf16.msra.mxu0 %v511_v1  ;;  %505 = vmatpush3.bf16.msra.mxu1 %v511_v1 }
   0x8   :  { %483 = vmatprep.subr.bf16.mxu0 %v512_v5  ;;  %503 = vmatprep.subr.bf16.mxu1 %v512_v5 }
   0x9   :  { %10 = vsyncpa [#allocation3], 0  ;;  %493 = vmatprep.mubr.msk.bf16.mxu1 %vm77_vm0, %v42_v8  ;;  %v39_v17 = vpack.c.bf16 %v25_v10, %v24_v9  ;;  %v43_v18 = vpack.c.bf16 %v33_v12, %v32_v11  ;;  %v40_v19 = vpack.c.bf16 %v27_v14, %v26_v13  ;;  %v44_v20 = vpack.c.bf16 %v35_v16, %v34_v15  ;;  %v28_v21 = vld [vmem:[%s824_s0 + $0x30] sm:$0xff]  ;;  %v29_v22 = vld [vmem:[%s824_s0 + $0x38] sm:$0xff] }
   0xa   :  { %v36_v23 = vld [vmem:[%s824_s0 + $0x70] sm:$0xff]  ;;  %v37_v24 = vld [vmem:[%s824_s0 + $0x78] sm:$0xff]  ;;  %v41_v25 = vpack.c.bf16 %v29_v22, %v28_v21  ;;  %v454_v27 = vld [vmem:[%s826_s2] ss:$0 sm:$0xff] }
   0xb   :  { %484 = vmatpush3.bf16.msra.mxu0 %v512_v5  ;;  %506 = vmatpush3.bf16.msra.mxu1 %v512_v5  ;;  %v45_v26 = vpack.c.bf16 %v37_v24, %v36_v23 }
   0xe   :  { %486 = vmatmul.mubr.msk.bf16.vlgmr.msra.gmra.mrb[0].mxu0 %vm77_vm0, %v39_v17  ;;  %494 = vmatmul.mubr.msk.bf16.vlgmr.msra.gmra.mrb[0].mxu1 %vm77_vm0, %v43_v18 }
   0xf   :  { %489 = vmatprep.mubr.msk.bf16.mxu0 %vm77_vm0, %v40_v19  ;;  %497 = vmatprep.mubr.msk.bf16.mxu1 %vm77_vm0, %v44_v20 }
  0x16   :  { %490 = vmatmul.mubr.msk.bf16.gmra.mrb[4].mxu0 %vm77_vm0, %v41_v25  ;;  %498 = vmatmul.mubr.msk.bf16.gmra.mrb[4].mxu1 %vm77_vm0, %v45_v26 }
  0xe1   :  { %v487_v28 = vpop.f32.mrb[0].mxu0  ;;  %v495_v29 = vpop.f32.mrb[0].mxu1 }
  0xe2   :  { %v145_v30 = vadd.f32 %v487_v28, %v454_v27  ;;  %v177_v31 = vadd.f32 %v495_v29, %v454_v27  ;;  %v136_v32 = vpop.f32.mrb[1].mxu0  ;;  %v168_v33 = vpop.f32.mrb[1].mxu1 }
  0xe3   :  { %v488_v34 = vpop.f32.mrb[2].mxu0  ;;  %v496_v35 = vpop.f32.mrb[2].mxu1  ;;  %v137_v38 = vadd.f32 %v454_v27, %v136_v32  ;;  %v169_v42 = vadd.f32 %v454_v27, %v168_v33 }
  0xe4   :  { %221 = vadd.xlane.f32.xlu0 %v177_v31  ;;  %v171_v36 = vpop.f32.mrb[3].mxu1  ;;  %205 = vadd.xlane.f32.xlu1 %v145_v30  ;;  %v139_v37 = vpop.f32.mrb[3].mxu0  ;;  %v148_v39 = vadd.f32 %v488_v34, %v454_v27  ;;  %v180_v43 = vadd.f32 %v496_v35, %v454_v27 }
  0xe5   :  { %v172_v50 = vadd.f32 %v454_v27, %v171_v36  ;;  %v140_v51 = vadd.f32 %v454_v27, %v139_v37 }
  0xe8   :  { %207 = vadd.xlane.f32.xlu1 %v148_v39  ;;  %201 = vadd.xlane.f32.xlu0 %v137_v38 }
  0xe9   :  { %v491_v40 = vpop.f32.mrb[4].mxu0  ;;  %v499_v41 = vpop.f32.mrb[4].mxu1 }
  0xea   :  { %v152_v44 = vpop.f32.mrb[5].mxu0  ;;  %v184_v45 = vpop.f32.mrb[5].mxu1  ;;  %v161_v52 = vadd.f32 %v491_v40, %v454_v27  ;;  %v679_v58 = vadd.f32 %v499_v41, %v454_v27 }
  0xeb   :  { %v492_v46 = vpop.f32.mrb[6].mxu0  ;;  %v500_v47 = vpop.f32.mrb[6].mxu1  ;;  %v153_v54 = vadd.f32 %v454_v27, %v152_v44  ;;  %v672_v56 = vadd.f32 %v454_v27, %v184_v45 }
  0xec   :  { %223 = vadd.xlane.f32.xlu1 %v180_v43  ;;  %217 = vadd.xlane.f32.xlu0 %v169_v42  ;;  %v155_v48 = vpop.f32.mrb[7].mxu0  ;;  %v187_v49 = vpop.f32.mrb[7].mxu1  ;;  %v164_v53 = vadd.f32 %v492_v46, %v454_v27  ;;  %v681_v59 = vadd.f32 %v500_v47, %v454_v27 }
  0xed   :  { %v670_v55 = vadd.f32 %v454_v27, %v155_v48  ;;  %v675_v57 = vadd.f32 %v454_v27, %v187_v49 }
  0xf0   :  { %219 = vadd.xlane.f32.xlu1 %v172_v50  ;;  %203 = vadd.xlane.f32.xlu0 %v140_v51 }
  0xf4   :  { %215 = vadd.xlane.f32.xlu1 %v164_v53  ;;  %213 = vadd.xlane.f32.xlu0 %v161_v52 }
  0xf8   :  { %211 = vadd.xlane.f32.xlu1 %v670_v55  ;;  %209 = vadd.xlane.f32.xlu0 %v153_v54 }
  0xfc   :  { %227 = vadd.xlane.f32.xlu1 %v675_v57  ;;  %225 = vadd.xlane.f32.xlu0 %v672_v56 }
 0x100   :  { %231 = vadd.xlane.f32.xlu1 %v681_v59  ;;  %229 = vadd.xlane.f32.xlu0 %v679_v58 }
 0x171   :  { %v222_v60 = vpop.xlane.xlu0 %221  ;;  %v206_v61 = vpop.xlane.xlu1 %205 }
 0x172   :  { %v244_v62 = vmul.f32 0.0078125, %v222_v60  ;;  %v236_v63 = vmul.f32 0.0078125, %v206_v61 }
 0x174   :  { %v685_v0 = vsub.f32 %v145_v30, %v236_v63  ;;  %v687_v3 = vsub.f32 %v177_v31, %v244_v62 }
 0x175   :  { %v208_v1 = vpop.xlane.xlu1 %207  ;;  %v202_v2 = vpop.xlane.xlu0 %201 }
 0x176   :  { %v237_v4 = vmul.f32 0.0078125, %v208_v1  ;;  %v234_v5 = vmul.f32 0.0078125, %v202_v2  ;;  %v268_v6 = vmul.f32 %v685_v0, %v685_v0  ;;  %v276_v14 = vmul.f32 %v687_v3, %v687_v3 }
 0x178   :  { %v691_v7 = vsub.f32 %v148_v39, %v237_v4  ;;  %286 = vadd.xlane.f32.xlu0 %v268_v6  ;;  %v693_v8 = vsub.f32 %v137_v38, %v234_v5 }
 0x179   :  { %v224_v9 = vpop.xlane.xlu1 %223  ;;  %v218_v10 = vpop.xlane.xlu0 %217 }
 0x17a   :  { %v245_v11 = vmul.f32 0.0078125, %v224_v9  ;;  %v242_v12 = vmul.f32 0.0078125, %v218_v10  ;;  %v269_v13 = vmul.f32 %v691_v7, %v691_v7  ;;  %v266_v18 = vmul.f32 %v693_v8, %v693_v8 }
 0x17c   :  { %v699_v15 = vsub.f32 %v180_v43, %v245_v11  ;;  %288 = vadd.xlane.f32.xlu1 %v269_v13  ;;  %302 = vadd.xlane.f32.xlu0 %v276_v14  ;;  %v703_v19 = vsub.f32 %v169_v42, %v242_v12 }
 0x17d   :  { %v220_v16 = vpop.xlane.xlu1 %219  ;;  %v204_v17 = vpop.xlane.xlu0 %203 }
 0x17e   :  { %v243_v20 = vmul.f32 0.0078125, %v220_v16  ;;  %v235_v21 = vmul.f32 0.0078125, %v204_v17  ;;  %v277_v22 = vmul.f32 %v699_v15, %v699_v15  ;;  %v274_v29 = vmul.f32 %v703_v19, %v703_v19 }
 0x180   :  { %v707_v23 = vsub.f32 %v140_v51, %v235_v21  ;;  %304 = vadd.xlane.f32.xlu1 %v277_v22  ;;  %282 = vadd.xlane.f32.xlu0 %v266_v18  ;;  %v709_v24 = vsub.f32 %v172_v50, %v243_v20  ;;  %v757_v22 = vld [vmem:[%s827_s3] ss:$0 sm:$0xff]  ;;  %s569_s3 = smov [#allocation2]  }
 0x181   :  { %v216_v25 = vpop.xlane.xlu1 %215  ;;  %v214_v26 = vpop.xlane.xlu0 %213 }
 0x182   :  { %v241_v27 = vmul.f32 0.0078125, %v216_v25  ;;  %v240_v28 = vmul.f32 0.0078125, %v214_v26  ;;  %v267_v30 = vmul.f32 %v707_v23, %v707_v23  ;;  %v275_v34 = vmul.f32 %v709_v24, %v709_v24 }
 0x184   :  { %v715_v31 = vsub.f32 %v161_v52, %v240_v28  ;;  %298 = vadd.xlane.f32.xlu0 %v274_v29  ;;  %284 = vadd.xlane.f32.xlu1 %v267_v30  ;;  %v719_v35 = vsub.f32 %v164_v53, %v241_v27  ;;  %v763_v30 = vld [vmem:[%s828_s4] ss:$0 sm:$0xff]  ;;  %s443_s4 = sshll.u32 %s569_s3, 4  ;;  %s444_s4 = int_to_ptr.vmem [resolvable:$true] %s443_s4 }
 0x185   :  { %v212_v32 = vpop.xlane.xlu1 %211  ;;  %v210_v33 = vpop.xlane.xlu0 %209  ;;  %s545_s9 = scalar_lea.vmem %s444_s4, 2048  ;;  %p550_p1 = scmp.lt.s32.totalorder %s444_s4, %s444_s4 }
 0x186   :  { %v239_v36 = vmul.f32 0.0078125, %v212_v32  ;;  %v238_v37 = vmul.f32 0.0078125, %v210_v33  ;;  %v272_v38 = vmul.f32 %v715_v31, %v715_v31  ;;  %v273_v45 = vmul.f32 %v719_v35, %v719_v35  ;;  %p546_p0 = scmp.ne.s32.totalorder %s444_s4, %s545_s9  ;;  %p551_p2 = scmp.lt.s32.totalorder %s545_s9, %s545_s9 }
 0x188   :  { %v723_v39 = vsub.f32 %v153_v54, %v238_v37  ;;  %300 = vadd.xlane.f32.xlu1 %v275_v34  ;;  %294 = vadd.xlane.f32.xlu0 %v272_v38  ;;  %v726_v40 = vsub.f32 %v670_v55, %v239_v36  ;;  %p552_p3 = por %p551_p2, %p550_p1 }
 0x189   :  { %v228_v41 = vpop.xlane.xlu1 %227  ;;  %v226_v42 = vpop.xlane.xlu0 %225 }
 0x18a   :  { %v247_v43 = vmul.f32 0.0078125, %v228_v41  ;;  %v246_v44 = vmul.f32 0.0078125, %v226_v42  ;;  %v270_v46 = vmul.f32 %v723_v39, %v723_v39  ;;  %v271_v50 = vmul.f32 %v726_v40, %v726_v40  ;;  %p553_p4 = pnand %p552_p3, %p546_p0 }
 0x18c   :  { %v733_v47 = vsub.f32 %v672_v56, %v246_v44  ;;  %296 = vadd.xlane.f32.xlu1 %v273_v45  ;;  %290 = vadd.xlane.f32.xlu0 %v270_v46  ;;  %v738_v51 = vsub.f32 %v675_v57, %v247_v43 }
 0x18d   :  { %v232_v48 = vpop.xlane.xlu1 %231  ;;  %v230_v49 = vpop.xlane.xlu0 %229 }
 0x18e   :  { %v249_v52 = vmul.f32 0.0078125, %v232_v48  ;;  %v248_v53 = vmul.f32 0.0078125, %v230_v49  ;;  %v278_v54 = vmul.f32 %v733_v47, %v733_v47  ;;  %v279_v60 = vmul.f32 %v738_v51, %v738_v51 }
 0x190   :  { %v743_v55 = vsub.f32 %v679_v58, %v248_v53  ;;  %292 = vadd.xlane.f32.xlu1 %v271_v50  ;;  %306 = vadd.xlane.f32.xlu0 %v278_v54  ;;  %v746_v56 = vsub.f32 %v681_v59, %v249_v52 }
 0x192   :  { %v280_v57 = vmul.f32 %v743_v55, %v743_v55  ;;  %v281_v61 = vmul.f32 %v746_v56, %v746_v56 }
 0x194   :  { %308 = vadd.xlane.f32.xlu1 %v279_v60  ;;  %310 = vadd.xlane.f32.xlu0 %v280_v57 }
 0x198   :  { %312 = vadd.xlane.f32.xlu1 %v281_v61 }
 0x205   :  { %v287_v62 = vpop.xlane.xlu0 %286 }
 0x206   :  { %v316_v58 = vmul.f32 0.0078125, %v287_v62 }
 0x208   :  { %v332_v63 = vadd.f32 1e-05, %v316_v58 }
 0x209   :  { %v289_v1 = vpop.xlane.xlu1 %288  ;;  %v303_v2 = vpop.xlane.xlu0 %302 }
 0x20a   :  { %513 = vrsqrt.f32 %v332_v63  ;;  %v317_v59 = vmul.f32 0.0078125, %v289_v1  ;;  %v324_v4 = vmul.f32 0.0078125, %v303_v2 }
 0x20c   :  { %v333_v5 = vadd.f32 1e-05, %v317_v59  ;;  %v340_v6 = vadd.f32 1e-05, %v324_v4 }
 0x20d   :  { %v305_v9 = vpop.xlane.xlu1 %304  ;;  %v283_v10 = vpop.xlane.xlu0 %282 }
 0x20e   :  { %515 = vrsqrt.f32 %v333_v5  ;;  %v325_v11 = vmul.f32 0.0078125, %v305_v9  ;;  %v314_v12 = vmul.f32 0.0078125, %v283_v10 }
 0x20f   :  { %517 = vrsqrt.f32 %v340_v6 }
 0x210   :  { %v341_v13 = vadd.f32 1e-05, %v325_v11  ;;  %v330_v14 = vadd.f32 1e-05, %v314_v12 }
 0x211   :  { %v285_v16 = vpop.xlane.xlu1 %284  ;;  %v299_v17 = vpop.xlane.xlu0 %298 }
 0x212   :  { %519 = vrsqrt.f32 %v341_v13  ;;  %v315_v18 = vmul.f32 0.0078125, %v285_v16  ;;  %v322_v20 = vmul.f32 0.0078125, %v299_v17 }
 0x213   :  { %521 = vrsqrt.f32 %v330_v14 }
 0x214   :  { %v514_v21 = vpop.eup %513  ;;  %v331_v25 = vadd.f32 1e-05, %v315_v18  ;;  %v338_v26 = vadd.f32 1e-05, %v322_v20 }
 0x215   :  { %v364_v27 = vmul.f32 %v514_v21, %v685_v0  ;;  %v301_v28 = vpop.xlane.xlu1 %300  ;;  %v295_v29 = vpop.xlane.xlu0 %294 }
 0x216   :  { %523 = vrsqrt.f32 %v331_v25  ;;  %v323_v32 = vmul.f32 0.0078125, %v301_v28  ;;  %v320_v33 = vmul.f32 0.0078125, %v295_v29 }
 0x217   :  { %v386_v34 = vmul.f32 %v757_v22, %v364_v27  ;;  %525 = vrsqrt.f32 %v338_v26 }
 0x218   :  { %v516_v36 = vpop.eup %515  ;;  %v339_v37 = vadd.f32 1e-05, %v323_v32  ;;  %v336_v38 = vadd.f32 1e-05, %v320_v33 }
 0x219   :  { %v518_v41 = vpop.eup %517  ;;  %v408_v42 = vadd.f32 %v763_v30, %v386_v34  ;;  %v365_v0 = vmul.f32 %v516_v36, %v691_v7  ;;  %v297_v43 = vpop.xlane.xlu1 %296 }
 0x21a   :  { %v291_v44 = vpop.xlane.xlu0 %290  ;;  %v372_v45 = vmul.f32 %v518_v41, %v687_v3  ;;  %527 = vrsqrt.f32 %v339_v37  ;;  %v321_v46 = vmul.f32 0.0078125, %v297_v43 }
 0x21b   :  { %v318_v48 = vmul.f32 0.0078125, %v291_v44  ;;  %424 = vst [vmem:[#allocation2 + $0x10] sm:$0xff] %v408_v42  ;;  %v387_v49 = vmul.f32 %v757_v22, %v365_v0  ;;  %529 = vrsqrt.f32 %v336_v38 }
 0x21c   :  { %v520_v50 = vpop.eup %519  ;;  %v394_v52 = vmul.f32 %v757_v22, %v372_v45  ;;  %v337_v53 = vadd.f32 1e-05, %v321_v46 }
 0x21d   :  { %v334_v54 = vadd.f32 1e-05, %v318_v48  ;;  %v522_v60 = vpop.eup %521  ;;  %v409_v57 = vadd.f32 %v763_v30, %v387_v49  ;;  %v373_v7 = vmul.f32 %v520_v50, %v699_v15  ;;  %v293_v61 = vpop.xlane.xlu1 %292 }
 0x21e   :  { %v307_v62 = vpop.xlane.xlu0 %306  ;;  %v416_v3 = vadd.f32 %v763_v30, %v394_v52  ;;  %v362_v58 = vmul.f32 %v522_v60, %v693_v8  ;;  %531 = vrsqrt.f32 %v337_v53  ;;  %v319_v63 = vmul.f32 0.0078125, %v293_v61 }
 0x21f   :  { %425 = vst [vmem:[#allocation2 + $0x18] sm:$0xff] %v409_v57  ;;  %v395_v1 = vmul.f32 %v757_v22, %v373_v7  ;;  %533 = vrsqrt.f32 %v334_v54  ;;  %v326_v2 = vmul.f32 0.0078125, %v307_v62 }
 0x220   :  { %v524_v59 = vpop.eup %523  ;;  %432 = vst [vmem:[#allocation2 + $0x50] sm:$0xff] %v416_v3  ;;  %v384_v4 = vmul.f32 %v757_v22, %v362_v58  ;;  %v335_v5 = vadd.f32 1e-05, %v319_v63 }
 0x221   :  { %v526_v6 = vpop.eup %525  ;;  %v417_v15 = vadd.f32 %v763_v30, %v395_v1  ;;  %v363_v9 = vmul.f32 %v524_v59, %v707_v23  ;;  %v342_v10 = vadd.f32 1e-05, %v326_v2  ;;  %v309_v11 = vpop.xlane.xlu1 %308 }
 0x222   :  { %v311_v8 = vpop.xlane.xlu0 %310  ;;  %v406_v12 = vadd.f32 %v763_v30, %v384_v4  ;;  %v370_v13 = vmul.f32 %v526_v6, %v703_v19  ;;  %535 = vrsqrt.f32 %v335_v5  ;;  %v327_v14 = vmul.f32 0.0078125, %v309_v11 }
 0x223   :  { %433 = vst [vmem:[#allocation2 + $0x58] sm:$0xff] %v417_v15  ;;  %v385_v16 = vmul.f32 %v757_v22, %v363_v9  ;;  %537 = vrsqrt.f32 %v342_v10  ;;  %v328_v17 = vmul.f32 0.0078125, %v311_v8 }
 0x224   :  { %v528_v18 = vpop.eup %527  ;;  %422 = vst [vmem:[#allocation2] sm:$0xff] %v406_v12  ;;  %v392_v20 = vmul.f32 %v757_v22, %v370_v13  ;;  %v343_v21 = vadd.f32 1e-05, %v327_v14 }
 0x225   :  { %v530_v23 = vpop.eup %529  ;;  %v407_v25 = vadd.f32 %v763_v30, %v385_v16  ;;  %v371_v26 = vmul.f32 %v528_v18, %v709_v24  ;;  %v344_v27 = vadd.f32 1e-05, %v328_v17  ;;  %v313_v28 = vpop.xlane.xlu1 %312 }
 0x226   :  { %v414_v19 = vadd.f32 %v763_v30, %v392_v20  ;;  %v368_v29 = vmul.f32 %v530_v23, %v715_v31  ;;  %539 = vrsqrt.f32 %v343_v21  ;;  %v329_v32 = vmul.f32 0.0078125, %v313_v28 }
 0x227   :  { %423 = vst [vmem:[#allocation2 + $0x8] sm:$0xff] %v407_v25  ;;  %v393_v33 = vmul.f32 %v757_v22, %v371_v26  ;;  %541 = vrsqrt.f32 %v344_v27 }
 0x228   :  { %v532_v34 = vpop.eup %531  ;;  %430 = vst [vmem:[#allocation2 + $0x40] sm:$0xff] %v414_v19  ;;  %v390_v36 = vmul.f32 %v757_v22, %v368_v29  ;;  %v345_v37 = vadd.f32 1e-05, %v329_v32 }
 0x229   :  { %v534_v38 = vpop.eup %533  ;;  %v415_v24 = vadd.f32 %v763_v30, %v393_v33  ;;  %v369_v41 = vmul.f32 %v532_v34, %v719_v35 }
 0x22a   :  { %v412_v42 = vadd.f32 %v763_v30, %v390_v36  ;;  %v366_v31 = vmul.f32 %v534_v38, %v723_v39  ;;  %543 = vrsqrt.f32 %v345_v37 }
 0x22b   :  { %431 = vst [vmem:[#allocation2 + $0x48] sm:$0xff] %v415_v24  ;;  %v391_v0 = vmul.f32 %v757_v22, %v369_v41 }
 0x22c   :  { %v536_v43 = vpop.eup %535  ;;  %428 = vst [vmem:[#allocation2 + $0x30] sm:$0xff] %v412_v42  ;;  %v388_v44 = vmul.f32 %v757_v22, %v366_v31 }
 0x22d   :  { %v538_v45 = vpop.eup %537  ;;  %v413_v46 = vadd.f32 %v763_v30, %v391_v0  ;;  %v367_v48 = vmul.f32 %v536_v43, %v726_v40 }
 0x22e   :  { %v410_v49 = vadd.f32 %v763_v30, %v388_v44  ;;  %v374_v35 = vmul.f32 %v538_v45, %v733_v47 }
 0x22f   :  { %429 = vst [vmem:[#allocation2 + $0x38] sm:$0xff] %v413_v46  ;;  %v389_v39 = vmul.f32 %v757_v22, %v367_v48 }
 0x230   :  { %v540_v50 = vpop.eup %539  ;;  %426 = vst [vmem:[#allocation2 + $0x20] sm:$0xff] %v410_v49  ;;  %v396_v52 = vmul.f32 %v757_v22, %v374_v35 }
 0x231   :  { %v542_v53 = vpop.eup %541  ;;  %v411_v54 = vadd.f32 %v763_v30, %v389_v39  ;;  %v375_v60 = vmul.f32 %v540_v50, %v738_v51 }
 0x232   :  { %v418_v57 = vadd.f32 %v763_v30, %v396_v52  ;;  %v376_v40 = vmul.f32 %v542_v53, %v743_v55 }
 0x233   :  { %427 = vst [vmem:[#allocation2 + $0x28] sm:$0xff] %v411_v54  ;;  %v397_v7 = vmul.f32 %v757_v22, %v375_v60 }
 0x234   :  { %v544_v47 = vpop.eup %543  ;;  %434 = vst [vmem:[#allocation2 + $0x60] sm:$0xff] %v418_v57  ;;  %v398_v61 = vmul.f32 %v757_v22, %v376_v40 }
 0x235   :  { %v419_v62 = vadd.f32 %v763_v30, %v397_v7  ;;  %v377_v3 = vmul.f32 %v544_v47, %v746_v56 }
 0x236   :  { %v420_v58 = vadd.f32 %v763_v30, %v398_v61 }
 0x237   :  { %435 = vst [vmem:[#allocation2 + $0x68] sm:$0xff] %v419_v62  ;;  %v399_v51 = vmul.f32 %v757_v22, %v377_v3 }
 0x238   :  { %436 = vst [vmem:[#allocation2 + $0x70] sm:$0xff] %v420_v58 }
 0x239   :  { %v421_v55 = vadd.f32 %v763_v30, %v399_v51 }
 0x23b   :  { %437 = vst [vmem:[#allocation2 + $0x78] sm:$0xff] %v421_v55 }
 0x23c   :  { %556 = shalt.err (!%p553_p4)
}
 0x23d   :  { %s557_s12 = scalar_lea.hbm %s829_s5, 2048 }
 0x23e   :  { %p558_p5 = scmp.ne.s32.totalorder %s829_s5, %s557_s12  ;;  %p561_p6 = scmp.lt.u32.totalorder %s557_s12, %s829_s5 }
 0x240   :  { %p563_p7 = pnand %p561_p6, %p558_p5 }
 0x242   :  { %566 = shalt.err (!%p563_p7)
}
 0x243   :  { %s570_s16 = smov 128   ;;  %s571_s17 = smov 8  }
 0x244   :  { %449 = dma.vmem_to_hbm [thread:$0]  %s444_s4, 2048, %s829_s5, [#allocation3], %s570_s16, %s570_s16, %s571_s17  }
 0x245   :  { %567 = dma.done.wait [#allocation3], 2048  }
 0x246   :  { %568 = vsyncadd [#allocation3], 4294965248 }
 0x247   :  { %453 = vsyncpa [#allocation3], 1 }

</bundles_post_ra>
